<compile_context>
chip_gen: v5e
topology: v5e:2x2
jax: 0.10.0
libtpu: 0.0.40
codegen_flags: <defaults>
</compile_context>

<pallas_src>
import functools
import math

import jax
import jax.numpy as jnp
from jax.experimental import pallas as pl
from jax.experimental.pallas import tpu as pltpu


_EPS = 1e-8
_LOG_EPS = math.log(_EPS)


def _focal_pow(x, gamma):
    """(1 - p)^gamma.  Integer gamma -> square-and-multiply (pure VPU);
    fractional gamma falls back to jnp.power (exp + log on the EUP)."""
    g = float(gamma)
    if g.is_integer() and 0 <= int(g) <= 16:
        n = int(g)
        if n == 0:
            return jnp.ones_like(x)
        result = None
        base = x
        while n:
            if n & 1:
                result = base if result is None else result * base
            n >>= 1
            if n:
                base = base * base
        return result
    # TODO(synk): fractional gamma costs 2 extra EUP ops/pixel (exp+log).
    return jnp.power(x, g)


def _focal_loss_kernel(logit_ref, tgt_ref, w_ref, out_ref, acc_ref,
                       *, gamma: float, num_classes: int):
    # Grid = (batch, pixel-supertile [parallel], pixel-tile [arbitrary/reduce]).
    j = pl.program_id(2)

    @pl.when(j == 0)
    def _():
        acc_ref[...] = jnp.zeros_like(acc_ref)

    t = tgt_ref[0, 0]                                      # (R, 128) int32 targets

    # Running max over the (small, leading) class axis: C-1 dense VPU maxes.
    m = logit_ref[0, 0].astype(jnp.float32)                # (R, 128)
    for c in range(1, num_classes):
        m = jnp.maximum(m, logit_ref[0, c].astype(jnp.float32))

    # One pass over classes: softmax denominator plus target-class gather of
    # (x_c - m), exp(x_c - m) and class_weight, all as dense (R, 128) selects.
    denom = jnp.zeros_like(m)
    xm_t = jnp.zeros_like(m)
    exp_t = jnp.zeros_like(m)
    cw = jnp.zeros_like(m)
    for c in range(num_classes):
        xm_c = logit_ref[0, c].astype(jnp.float32) - m
        e_c = jnp.exp(xm_c)                                # one EUP exp per class
        denom = denom + e_c
        sel = t == c
        xm_t = jnp.where(sel, xm_c, xm_t)
        exp_t = jnp.where(sel, e_c, exp_t)
        cw = jnp.where(sel, w_ref[c], cw)                  # scalar gathered from SMEM

    # Reuse exp(xm_t): p = exp_t / denom -- no second exponential.
    recip = pl.reciprocal(denom)       # exact; approx=True is cheaper if tolerance allows
    p = exp_t * recip
    logp = xm_t - jnp.log(denom)       # log-softmax prob of the target class

    # clamp(prob, 1e-8, 1 - 1e-8); log(1 - 1e-8) rounds to 0 in f32, so clipping
    # logp to [log(1e-8), 0] matches the reference exactly.
    p_c = jnp.clip(p, _EPS, 1.0 - _EPS)
    logp_c = jnp.clip(logp, _LOG_EPS, 0.0)

    focal = _focal_pow(1.0 - p_c, gamma)

    # Dense (R, 128) accumulate; padded pixels (t == -1) have cw == 0 -> contribute 0.
    acc_ref[...] += -(cw * focal * logp_c)

    @pl.when(j == pl.num_programs(2) - 1)
    def _():
        total = jnp.sum(acc_ref[...])
        out_ref[...] = jnp.broadcast_to(total, out_ref.shape).astype(out_ref.dtype)


def _vmem_capacity_bytes():
    try:
        info = pltpu.get_tpu_info()
        cap = int(getattr(info, "vmem_capacity_bytes", 0))
        if cap > 0:
            return cap
    except Exception:
        pass
    return 64 * 1024 * 1024   # conservative (v7x-sized) fallback


def _choose_rows(nr, c, itemsize, vmem_cap):
    """Rows-of-128-pixels per tile.  The logits block targets ~vmem_cap/16
    (capped at 8 MiB) so double-buffered inputs + elementwise temporaries + the
    dense accumulator fit comfortably on every generation (v7x: 64 MiB VMEM,
    v5e/v6e: 128 MiB)."""
    target = min(vmem_cap // 16, 8 * 1024 * 1024)
    r_budget = max(8, (target // (c * 128 * itemsize)) // 8 * 8)
    if nr <= r_budget:
        return nr, 1
    n_tiles = -(-nr // r_budget)
    return r_budget, n_tiles


def focal_loss_2d(logit_nchw, target_bhw, class_weight, gamma=2.0,
                  size_average=True):
    """logit_nchw: (B, C, H, W) float; target_bhw: (B, H, W) int;
    class_weight: (C,) float.  Returns the scalar mean focal loss
    (softmax variant of FocalLoss2d)."""
    assert size_average, "only size_average=True implemented"
    # TODO(synk): type='sigmoid' branch and size_average=False not implemented.
    B, C, H, W = logit_nchw.shape
    HW = H * W
    N = B * HW

    vmem_cap = _vmem_capacity_bytes()
    itemsize = jnp.dtype(logit_nchw.dtype).itemsize
    nr = -(-HW // 128)                             # rows of 128 pixels (ceil)
    R, n_tiles = _choose_rows(nr, C, itemsize, vmem_cap)
    # Even tile count -> the supertile axis can feed both v7x TensorCores even
    # when B == 1 (extra padding pixels contribute exactly 0 to the loss).
    if n_tiles > 1 and n_tiles % 2 == 1:
        n_tiles += 1
    n_outer = 2 if n_tiles % 2 == 0 else 1
    n_inner = n_tiles // n_outer
    nr_pad = R * n_tiles
    hw_pad = nr_pad * 128

    # NCHW consumed directly as a contiguous (B, C, HW/128, 128) view: pixels
    # occupy both sublanes and lanes, the class axis is a leading dim.
    logits = logit_nchw.reshape(B, C, HW)
    targets = target_bhw.reshape(B, HW).astype(jnp.int32)
    if hw_pad != HW:
        logits = jnp.pad(logits, ((0, 0), (0, 0), (0, hw_pad - HW)))
        targets = jnp.pad(targets, ((0, 0), (0, hw_pad - HW)),
                          constant_values=-1)       # -1 never matches a class
    logits = logits.reshape(B, C, nr_pad, 128)
    targets = targets.reshape(B, 1, nr_pad, 128)
    weights = jnp.asarray(class_weight, dtype=jnp.float32).reshape(C)

    kernel = functools.partial(_focal_loss_kernel, gamma=float(gamma),
                               num_classes=C)

    logit_block_bytes = C * R * 128 * itemsize
    pix_block_bytes = R * 128 * 4
    # double-buffered inputs + ~6 per-pixel f32 temporaries + dense accumulator.
    vmem_needed = (2 * (logit_block_bytes + pix_block_bytes)
                   + 8 * pix_block_bytes + (1 << 20))
    vmem_limit = int(min(vmem_cap * 3 // 4, max(vmem_needed, 32 * 1024 * 1024)))

    partials = pl.pallas_call(
        kernel,
        out_shape=jax.ShapeDtypeStruct((B, n_outer, 1, 128), jnp.float32),
        grid_spec=pltpu.PrefetchScalarGridSpec(
            num_scalar_prefetch=0,
            grid=(B, n_outer, n_inner),
            in_specs=[
                pl.BlockSpec((1, C, R, 128),
                             lambda b, o, j: (b, 0, o * n_inner + j, 0)),
                pl.BlockSpec((1, 1, R, 128),
                             lambda b, o, j: (b, 0, o * n_inner + j, 0)),
                pl.BlockSpec(memory_space=pltpu.MemorySpace.SMEM),
            ],
            out_specs=pl.BlockSpec((1, 1, 1, 128),
                                   lambda b, o, j: (b, o, 0, 0)),
            scratch_shapes=[pltpu.VMEM((R, 128), jnp.float32)],
        ),
        compiler_params=pltpu.CompilerParams(
            # Batch and pixel-supertile axes are race-free (per-block partial
            # outputs) so they can be split across TensorCores; the inner pixel
            # tile axis carries the running accumulator -> "arbitrary".
            dimension_semantics=("parallel", "parallel", "arbitrary"),
            vmem_limit_bytes=vmem_limit),
    )(logits, targets, weights)

    total = jnp.sum(partials[:, :, 0, 0])
    return total / jnp.float32(N)


def _reference(logit_nchw, target_bhw, class_weight, gamma=2.0):
    B, C, H, W = logit_nchw.shape
    x = jnp.transpose(logit_nchw, (0, 2, 3, 1)).reshape(-1, C)
    t = target_bhw.reshape(-1).astype(jnp.int32)
    prob = jax.nn.softmax(x, axis=1)
    p = jnp.take_along_axis(prob, t[:, None], axis=1)[:, 0]
    p = jnp.clip(p, 1e-8, 1.0 - 1e-8)
    w = jnp.asarray(class_weight, dtype=jnp.float32)[t]
    loss = -w * jnp.power(1.0 - p, gamma) * jnp.log(p)
    return jnp.mean(loss)


if __name__ == "__main__":
    key = jax.random.PRNGKey(0)
    k1, k2 = jax.random.split(key)

    B, C, H, W = 2, 4, 16, 16
    logit = jax.random.normal(k1, (B, C, H, W), dtype=jnp.float32)
    target = jax.random.randint(k2, (B, H, W), 0, C, dtype=jnp.int32)
    # Deterministic per-class weights (PyTorch default [1, 5] extended to C classes).
    class_weight = jnp.array([1.0, 5.0, 2.0, 3.0], dtype=jnp.float32)

    loss = focal_loss_2d(logit, target, class_weight, gamma=2.0)
    loss = jax.block_until_ready(loss)

    ref = _reference(logit, target, class_weight, gamma=2.0)
    assert jnp.allclose(loss, ref, rtol=1e-4, atol=1e-6), (loss, ref)

    print("KERNEL_OK")
</pallas_src>

<mosaic_0001>
module attributes {stable_mosaic.version = 11 : i64} {
  func.func @_focal_loss_kernel(%arg0: i32, %arg1: i32, %arg2: i32, %arg3: memref<1x4x2x128xf32, #tpu.memory_space<vmem>>, %arg4: memref<1x1x2x128xi32, #tpu.memory_space<vmem>>, %arg5: memref<4xf32, #tpu.memory_space<smem>>, %arg6: memref<1x1x1x128xf32, #tpu.memory_space<vmem>>, %arg7: memref<2x128xf32, #tpu.memory_space<vmem>>) attributes {dimension_semantics = [#tpu.dimension_semantics<parallel>, #tpu.dimension_semantics<parallel>, #tpu.dimension_semantics<arbitrary>], iteration_bounds = array<i64: 2, 1, 1>, scalar_prefetch = 0 : i64, scratch_operands = 1 : i64, tpu.core_type = #tpu.core_type<tc>, window_params = [{transform_indices = @transform_0, window_bounds = array<i64: 1, 4, 2, 128>}, {transform_indices = @transform_1, window_bounds = array<i64: 1, 1, 2, 128>}, {transform_indices = @transform_2, window_bounds = array<i64: 4>}, {transform_indices = @transform_3, window_bounds = array<i64: 1, 1, 1, 128>}]} {
    %c0_i32 = arith.constant 0 : i32
    %0 = arith.cmpi eq, %arg2, %c0_i32 : i32
    %1 = arith.extui %0 : i1 to i32
    %c0_i32_0 = arith.constant 0 : i32
    %2 = arith.cmpi ne, %1, %c0_i32_0 : i32
    scf.if %2 {
      %cst_53 = arith.constant 0.000000e+00 : f32
      %93 = vector.broadcast %cst_53 : f32 to vector<2x128xf32>
      %c0_54 = arith.constant 0 : index
      %c0_55 = arith.constant 0 : index
      %94 = vector.load %arg7[%c0_54, %c0_55] : memref<2x128xf32, #tpu.memory_space<vmem>>, vector<2x128xf32>
      tpu.vector_store %arg7[%c0_54, %c0_55], %93 {strides = array<i32>} : memref<2x128xf32, #tpu.memory_space<vmem>>, vector<2x128xf32>,
    } else {
    }
    %c0 = arith.constant 0 : index
    %c0_1 = arith.constant 0 : index
    %c0_2 = arith.constant 0 : index
    %c0_3 = arith.constant 0 : index
    %3 = vector.load %arg4[%c0, %c0_1, %c0_2, %c0_3] : memref<1x1x2x128xi32, #tpu.memory_space<vmem>>, vector<1x1x2x128xi32>
    %4 = vector.shape_cast %3 : vector<1x1x2x128xi32> to vector<2x128xi32>
    %c0_4 = arith.constant 0 : index
    %c0_5 = arith.constant 0 : index
    %c0_6 = arith.constant 0 : index
    %c0_7 = arith.constant 0 : index
    %5 = vector.load %arg3[%c0_4, %c0_5, %c0_6, %c0_7] : memref<1x4x2x128xf32, #tpu.memory_space<vmem>>, vector<1x1x2x128xf32>
    %6 = vector.shape_cast %5 : vector<1x1x2x128xf32> to vector<2x128xf32>
    %c0_8 = arith.constant 0 : index
    %c1 = arith.constant 1 : index
    %c0_9 = arith.constant 0 : index
    %c0_10 = arith.constant 0 : index
    %7 = vector.load %arg3[%c0_8, %c1, %c0_9, %c0_10] : memref<1x4x2x128xf32, #tpu.memory_space<vmem>>, vector<1x1x2x128xf32>
    %8 = vector.shape_cast %7 : vector<1x1x2x128xf32> to vector<2x128xf32>
    %9 = arith.maximumf %6, %8 : vector<2x128xf32>
    %c0_11 = arith.constant 0 : index
    %c2 = arith.constant 2 : index
    %c0_12 = arith.constant 0 : index
    %c0_13 = arith.constant 0 : index
    %10 = vector.load %arg3[%c0_11, %c2, %c0_12, %c0_13] : memref<1x4x2x128xf32, #tpu.memory_space<vmem>>, vector<1x1x2x128xf32>
    %11 = vector.shape_cast %10 : vector<1x1x2x128xf32> to vector<2x128xf32>
    %12 = arith.maximumf %9, %11 : vector<2x128xf32>
    %c0_14 = arith.constant 0 : index
    %c3 = arith.constant 3 : index
    %c0_15 = arith.constant 0 : index
    %c0_16 = arith.constant 0 : index
    %13 = vector.load %arg3[%c0_14, %c3, %c0_15, %c0_16] : memref<1x4x2x128xf32, #tpu.memory_space<vmem>>, vector<1x1x2x128xf32>
    %14 = vector.shape_cast %13 : vector<1x1x2x128xf32> to vector<2x128xf32>
    %15 = arith.maximumf %12, %14 : vector<2x128xf32>
    %cst = arith.constant 0.000000e+00 : f32
    %16 = vector.broadcast %cst : f32 to vector<2x128xf32>
    %cst_17 = arith.constant 0.000000e+00 : f32
    %17 = vector.broadcast %cst_17 : f32 to vector<2x128xf32>
    %cst_18 = arith.constant 0.000000e+00 : f32
    %18 = vector.broadcast %cst_18 : f32 to vector<2x128xf32>
    %cst_19 = arith.constant 0.000000e+00 : f32
    %19 = vector.broadcast %cst_19 : f32 to vector<2x128xf32>
    %c0_20 = arith.constant 0 : index
    %c0_21 = arith.constant 0 : index
    %c0_22 = arith.constant 0 : index
    %c0_23 = arith.constant 0 : index
    %20 = vector.load %arg3[%c0_20, %c0_21, %c0_22, %c0_23] : memref<1x4x2x128xf32, #tpu.memory_space<vmem>>, vector<1x1x2x128xf32>
    %21 = vector.shape_cast %20 : vector<1x1x2x128xf32> to vector<2x128xf32>
    %22 = arith.subf %21, %15 : vector<2x128xf32>
    %23 = math.exp %22 : vector<2x128xf32>
    %24 = arith.addf %16, %23 : vector<2x128xf32>
    %c0_i32_24 = arith.constant 0 : i32
    %25 = vector.broadcast %c0_i32_24 : i32 to vector<2x128xi32>
    %26 = arith.cmpi eq, %4, %25 : vector<2x128xi32>
    %27 = arith.select %26, %22, %17 : vector<2x128xi1>, vector<2x128xf32>
    %28 = arith.select %26, %23, %18 : vector<2x128xi1>, vector<2x128xf32>
    %c0_25 = arith.constant 0 : index
    %29 = memref.load %arg5[%c0_25] : memref<4xf32, #tpu.memory_space<smem>>
    %30 = vector.broadcast %29 : f32 to vector<2x128xf32>
    %31 = arith.select %26, %30, %19 : vector<2x128xi1>, vector<2x128xf32>
    %c0_26 = arith.constant 0 : index
    %c1_27 = arith.constant 1 : index
    %c0_28 = arith.constant 0 : index
    %c0_29 = arith.constant 0 : index
    %32 = vector.load %arg3[%c0_26, %c1_27, %c0_28, %c0_29] : memref<1x4x2x128xf32, #tpu.memory_space<vmem>>, vector<1x1x2x128xf32>
    %33 = vector.shape_cast %32 : vector<1x1x2x128xf32> to vector<2x128xf32>
    %34 = arith.subf %33, %15 : vector<2x128xf32>
    %35 = math.exp %34 : vector<2x128xf32>
    %36 = arith.addf %24, %35 : vector<2x128xf32>
    %c1_i32 = arith.constant 1 : i32
    %37 = vector.broadcast %c1_i32 : i32 to vector<2x128xi32>
    %38 = arith.cmpi eq, %4, %37 : vector<2x128xi32>
    %39 = arith.select %38, %34, %27 : vector<2x128xi1>, vector<2x128xf32>
    %40 = arith.select %38, %35, %28 : vector<2x128xi1>, vector<2x128xf32>
    %c1_30 = arith.constant 1 : index
    %41 = memref.load %arg5[%c1_30] : memref<4xf32, #tpu.memory_space<smem>>
    %42 = vector.broadcast %41 : f32 to vector<2x128xf32>
    %43 = arith.select %38, %42, %31 : vector<2x128xi1>, vector<2x128xf32>
    %c0_31 = arith.constant 0 : index
    %c2_32 = arith.constant 2 : index
    %c0_33 = arith.constant 0 : index
    %c0_34 = arith.constant 0 : index
    %44 = vector.load %arg3[%c0_31, %c2_32, %c0_33, %c0_34] : memref<1x4x2x128xf32, #tpu.memory_space<vmem>>, vector<1x1x2x128xf32>
    %45 = vector.shape_cast %44 : vector<1x1x2x128xf32> to vector<2x128xf32>
    %46 = arith.subf %45, %15 : vector<2x128xf32>
    %47 = math.exp %46 : vector<2x128xf32>
    %48 = arith.addf %36, %47 : vector<2x128xf32>
    %c2_i32 = arith.constant 2 : i32
    %49 = vector.broadcast %c2_i32 : i32 to vector<2x128xi32>
    %50 = arith.cmpi eq, %4, %49 : vector<2x128xi32>
    %51 = arith.select %50, %46, %39 : vector<2x128xi1>, vector<2x128xf32>
    %52 = arith.select %50, %47, %40 : vector<2x128xi1>, vector<2x128xf32>
    %c2_35 = arith.constant 2 : index
    %53 = memref.load %arg5[%c2_35] : memref<4xf32, #tpu.memory_space<smem>>
    %54 = vector.broadcast %53 : f32 to vector<2x128xf32>
    %55 = arith.select %50, %54, %43 : vector<2x128xi1>, vector<2x128xf32>
    %c0_36 = arith.constant 0 : index
    %c3_37 = arith.constant 3 : index
    %c0_38 = arith.constant 0 : index
    %c0_39 = arith.constant 0 : index
    %56 = vector.load %arg3[%c0_36, %c3_37, %c0_38, %c0_39] : memref<1x4x2x128xf32, #tpu.memory_space<vmem>>, vector<1x1x2x128xf32>
    %57 = vector.shape_cast %56 : vector<1x1x2x128xf32> to vector<2x128xf32>
    %58 = arith.subf %57, %15 : vector<2x128xf32>
    %59 = math.exp %58 : vector<2x128xf32>
    %60 = arith.addf %48, %59 : vector<2x128xf32>
    %c3_i32 = arith.constant 3 : i32
    %61 = vector.broadcast %c3_i32 : i32 to vector<2x128xi32>
    %62 = arith.cmpi eq, %4, %61 : vector<2x128xi32>
    %63 = arith.select %62, %58, %51 : vector<2x128xi1>, vector<2x128xf32>
    %64 = arith.select %62, %59, %52 : vector<2x128xi1>, vector<2x128xf32>
    %c3_40 = arith.constant 3 : index
    %65 = memref.load %arg5[%c3_40] : memref<4xf32, #tpu.memory_space<smem>>
    %66 = vector.broadcast %65 : f32 to vector<2x128xf32>
    %67 = arith.select %62, %66, %55 : vector<2x128xi1>, vector<2x128xf32>
    %68 = tpu.reciprocal %60 : vector<2x128xf32> -> vector<2x128xf32>
    %69 = arith.mulf %64, %68 : vector<2x128xf32>
    %70 = math.log %60 : vector<2x128xf32>
    %71 = arith.subf %63, %70 : vector<2x128xf32>
    %cst_41 = arith.constant 9.99999993E-9 : f32
    %cst_42 = arith.constant 1.000000e+00 : f32
    %72 = vector.broadcast %cst_41 : f32 to vector<2x128xf32>
    %73 = arith.maximumf %72, %69 : vector<2x128xf32>
    %74 = vector.broadcast %cst_42 : f32 to vector<2x128xf32>
    %75 = arith.minimumf %74, %73 : vector<2x128xf32>
    %cst_43 = arith.constant -18.420681 : f32
    %cst_44 = arith.constant 0.000000e+00 : f32
    %76 = vector.broadcast %cst_43 : f32 to vector<2x128xf32>
    %77 = arith.maximumf %76, %71 : vector<2x128xf32>
    %78 = vector.broadcast %cst_44 : f32 to vector<2x128xf32>
    %79 = arith.minimumf %78, %77 : vector<2x128xf32>
    %cst_45 = arith.constant 1.000000e+00 : f32
    %80 = vector.broadcast %cst_45 : f32 to vector<2x128xf32>
    %81 = arith.subf %80, %75 : vector<2x128xf32>
    %82 = arith.mulf %81, %81 : vector<2x128xf32>
    %c0_46 = arith.constant 0 : index
    %c0_47 = arith.constant 0 : index
    %83 = vector.load %arg7[%c0_46, %c0_47] : memref<2x128xf32, #tpu.memory_space<vmem>>, vector<2x128xf32>
    %84 = arith.mulf %67, %82 : vector<2x128xf32>
    %85 = arith.mulf %84, %79 : vector<2x128xf32>
    %cst_48 = arith.constant 0.000000e+00 : f32
    %86 = vector.broadcast %cst_48 : f32 to vector<2x128xf32>
    %87 = arith.subf %86, %85 : vector<2x128xf32>
    %88 = arith.addf %83, %87 : vector<2x128xf32>
    %c0_49 = arith.constant 0 : index
    %c0_50 = arith.constant 0 : index
    %89 = vector.load %arg7[%c0_49, %c0_50] : memref<2x128xf32, #tpu.memory_space<vmem>>, vector<2x128xf32>
    tpu.vector_store %arg7[%c0_49, %c0_50], %88 {strides = array<i32>} : memref<2x128xf32, #tpu.memory_space<vmem>>, vector<2x128xf32>,
    %c0_i32_51 = arith.constant 0 : i32
    %90 = arith.cmpi eq, %arg2, %c0_i32_51 : i32
    %91 = arith.extui %90 : i1 to i32
    %c0_i32_52 = arith.constant 0 : i32
    %92 = arith.cmpi ne, %91, %c0_i32_52 : i32
    scf.if %92 {
      %c0_53 = arith.constant 0 : index
      %c0_54 = arith.constant 0 : index
      %93 = vector.load %arg7[%c0_53, %c0_54] : memref<2x128xf32, #tpu.memory_space<vmem>>, vector<2x128xf32>
      %94 = vector.shape_cast %93 : vector<2x128xf32> to vector<1x2x128xf32>
      %cst_55 = arith.constant dense<0.000000e+00> : vector<1xf32>
      %95 = vector.multi_reduction <add>, %94, %cst_55 [1, 2] : vector<1x2x128xf32> to vector<1xf32>
      %96 = vector.shape_cast %95 : vector<1xf32> to vector<1x1x1xf32>
      %97 = vector.extract %96[0, 0, 0] : f32 from vector<1x1x1xf32>
      %98 = vector.broadcast %97 : f32 to vector<1x1x1x128xf32>
      %c0_56 = arith.constant 0 : index
      %c0_57 = arith.constant 0 : index
      %c0_58 = arith.constant 0 : index
      %c0_59 = arith.constant 0 : index
      %99 = vector.load %arg6[%c0_56, %c0_57, %c0_58, %c0_59] : memref<1x1x1x128xf32, #tpu.memory_space<vmem>>, vector<1x1x1x128xf32>
      tpu.vector_store %arg6[%c0_56, %c0_57, %c0_58, %c0_59], %98 {strides = array<i32>} : memref<1x1x1x128xf32, #tpu.memory_space<vmem>>, vector<1x1x1x128xf32>,
    } else {
    }
    return
  }
  func.func @transform_0(%arg0: i32, %arg1: i32, %arg2: i32) -> (i32, i32, i32, i32) {
    %c1_i32 = arith.constant 1 : i32
    %0 = arith.muli %arg1, %c1_i32 : i32
    %1 = arith.addi %0, %arg2 : i32
    %c0_i32 = arith.constant 0 : i32
    %c0_i32_0 = arith.constant 0 : i32
    %c0_i32_1 = arith.constant 0 : i32
    return %arg0, %c0_i32, %1, %c0_i32_0 : i32, i32, i32, i32
  }
  func.func @transform_1(%arg0: i32, %arg1: i32, %arg2: i32) -> (i32, i32, i32, i32) {
    %c1_i32 = arith.constant 1 : i32
    %0 = arith.muli %arg1, %c1_i32 : i32
    %1 = arith.addi %0, %arg2 : i32
    %c0_i32 = arith.constant 0 : i32
    %c0_i32_0 = arith.constant 0 : i32
    %c0_i32_1 = arith.constant 0 : i32
    return %arg0, %c0_i32, %1, %c0_i32_0 : i32, i32, i32, i32
  }
  func.func @transform_2(%arg0: i32, %arg1: i32, %arg2: i32) -> i32 {
    %c0_i32 = arith.constant 0 : i32
    %c0_i32_0 = arith.constant 0 : i32
    return %c0_i32 : i32
  }
  func.func @transform_3(%arg0: i32, %arg1: i32, %arg2: i32) -> (i32, i32, i32, i32) {
    %c0_i32 = arith.constant 0 : i32
    %c0_i32_0 = arith.constant 0 : i32
    %c0_i32_1 = arith.constant 0 : i32
    return %arg0, %arg1, %c0_i32, %c0_i32_0 : i32, i32, i32, i32
  }
}

</mosaic_0001>

<bundles_post_ra>
// kernel: tpu_custom_call.1
= control target key start
LH: loop header
LB: loop body
LE: loop exit
PB: predicated region body
PF: predicated region fallthrough
CT: control target
= control target key end

     0   :  { %s1013_s0 = inlined_call_operand.hbm [shape: f32[2,4,2,128], index: 0, kind: input, shape index: {}]   ;;  %s1014_s1 = inlined_call_operand.hbm [shape: s32[2,1,2,128], index: 1, kind: input, shape index: {}]   ;;  %s1015_s2 = inlined_call_operand.vmem [shape: f32[4], index: 2, kind: input, shape index: {}]   ;;  %s1016_s3 = inlined_call_operand.hbm [shape: f32[2,1,1,128], index: 3, kind: output, shape index: {}]  }
   0x1   :  { %1020 = sst [smem:[#allocation17_spill]] %s1015_s2 }
   0x2   :  { %8 = vsyncpa [#allocation4], 0 }
   0x3   :  { %10 = vsyncpa [#allocation4 + $0x1], 0 }
   0x4   :  { %11 = vsyncpa [#allocation8], 0 }
   0x5   :  { %13 = vsyncpa [#allocation8 + $0x1], 0 }
   0x6   :  { %14 = vsyncpa [#allocation6], 0 }
   0x7   :  { %15 = vsyncpa [#allocation5], 0 }
   0x8   :  { %17 = vsyncpa [#allocation5 + $0x1], 0  ;;  %s822_s12 = smov 0   ;;  %s824_s13 = smov 0  }
   0x9   :  { %s826_s14 = smov 0   ;;  %s828_s15 = smov 0  }
   0xa   :  { %s830_s16 = smov 0   ;;  %s832_s17 = smov 0  }
   0xb LB: > { %1021 = sst [smem:[#allocation15_spill]] %s796_s17  ;;  %s513_s18 = sadd.s32 4294967295, %s796_s17   ;;  %s796_s17 = sphi %s832_s17, %s23_s17   ;;  %s792_s16 = sphi %s830_s16, %s1037_s16   ;;  %s788_s15 = sphi %s828_s15, %s1036_s15   ;;  %s784_s14 = sphi %s826_s14, %s1035_s14   ;;  %s780_s13 = sphi %s824_s13, %s1034_s13   ;;  %s776_s12 = sphi %s822_s12, %s1033_s12  }
   0xc   : > { %s514_s19 = sadd.s32 4294967294, %s796_s17   ;;  %s53_s20 = sadd.s32 1, %s784_s14 }
   0xd   : > { %p60_p0 = scmp.ne.s32.totalorder %s784_s14, %s780_s13  ;;  %p61_p1 = scmp.eq.s32.totalorder %s796_s17, 0 }
   0xe   : > { %p66_p2 = scmp.ne.s32.totalorder %s780_s13, %s776_s12  ;;  %p860_p3 = scmp.eq.s32.totalorder %s513_s18, 0 }
   0xf   : > { %p143_p4 = scmp.eq.s32.totalorder %s513_s18, 1  ;;  %p864_p5 = por %p61_p1, %p60_p0 }
  0x10   : > { %p149_p6 = scmp.eq.s32.totalorder %s514_s19, 1  ;;  %p870_p7 = por %p860_p3, %p66_p2 }
  0x11   : > { %p874_p8 = por %p143_p4, %p60_p0  ;;  %p515_p10 = scmp.ge.s32.totalorder %s796_s17, 1 }
  0x12   : > { %p878_p9 = por %p149_p6, %p66_p2  ;;  %p156_p11 = scmp.lt.s32.totalorder %s796_s17, 3 }
  0x13   : > { %s1027_s2 = sld [smem:[#allocation17_spill]]  ;;  %p517_p13 = scmp.ge.s32.totalorder %s796_s17, 2 }
  0x14   : > { %p887_p12 = pnand %p515_p10, %p156_p11  ;;  %p564_p0 = scmp.lt.s32.totalorder %s796_s17, 2 }
  0x15   : > { %s42_s4 = sadd.s32 1, %s792_s16  ;;  %s905_s5 = sand.u32 1, %s784_s14  }
  0x16   : > { %p548_p1 = pneg %p887_p12  ;;  %p897_p2 = pnand %p564_p0, %p864_p5 }
  0x17   : > { %p44_p6 = scmp.ge.s32.totalorder %s42_s4, 2  ;;  %s798_s6 = smov [#allocation9]  }
  0x18   : > { %p549_p4 = pnand %p548_p1, %p860_p3  ;;  %s518_s7 = sshll.u32 %s905_s5, 3 }
  0x19   : > { %s168_s28 = sshll.u32 %s1027_s2, 4  ;;  %s1039_s4 = smov (%p44_p6, %s42_s4), 0  ;;  %s169_s28 = int_to_ptr.vmem [resolvable:$true] %s168_s28 }
  0x1a   : > { %551 = dma.vmem_to_smem (!%p549_p4), %s169_s28, 16, %s798_s6, [#allocation6]  }
  0x1b   : > { %1030 = sst [smem:[#allocation16_spill]] %s1039_s4  ;;  %s48_s8 = ssub.s32 %s792_s16, %s1039_s4 }
  0x1c   : > { %p51_p5 = scmp.eq.s32.totalorder %s48_s8, 0  ;;  %s535_s9 = sshll.u32 %s792_s16, 3 }
  0x1d   : > { %s190_s18 = scalar_lea.hbm %s1013_s0, %s535_s9  ;;  %s183_s19 = scalar_lea.vmem [#allocation3], %s518_s7 }
  0x1e   : > { %s193_s22 = sshll.u32 %s183_s19, 4  ;;  %s191_s27 = sshll.u32 %s190_s18, 4  ;;  %s194_s22 = int_to_ptr.vmem [resolvable:$true] %s193_s22  ;;  %s192_s27 = int_to_ptr.hbm [resolvable:$true] %s191_s27 }
  0x1f   : > { %s919_s26 = scalar_select %p51_p5, %s784_s14, %s53_s20  }
  0x20   : > { %s180_s28 = scalar_lea.sflag [#allocation4], %s905_s5  ;;  %s799_s6 = smov 32  }
  0x21   : > { %s800_s2 = smov 2   ;;  %s521_s8 = sshll.u32 %s905_s5, 1 }
  0x22   : > { %555 = dma.hbm_to_vmem [thread:$0]  (!%p897_p2), %s192_s27, 128, %s194_s22, %s180_s28, %s799_s6, %s799_s6, %s800_s2  }
  0x23   : > { %s522_s4 = sshll.u32 %s792_s16, 1  ;;  %s207_s11 = scalar_lea.vmem [#allocation7], %s521_s8 }
  0x24   : > { %s213_s7 = scalar_lea.hbm %s1014_s1, %s522_s4  ;;  %s217_s20 = sshll.u32 %s207_s11, 4  ;;  %s218_s20 = int_to_ptr.vmem [resolvable:$true] %s217_s20 }
  0x25   : > { %s215_s9 = sshll.u32 %s213_s7, 4  ;;  %s204_s18 = scalar_lea.sflag [#allocation8], %s905_s5  ;;  %s216_s9 = int_to_ptr.hbm [resolvable:$true] %s215_s9 }
  0x26   : > { %558 = dma.hbm_to_vmem [thread:$0]  (!%p897_p2), %s216_s9, 32, %s218_s20, %s204_s18  }
  0x27   : > { %226 = sbr.rel (%p887_p12) target bundleno = 303 (0x12f), region = 32  ;;  %s935_s2 = sand.u32 (!%p887_p12), 1, %s780_s13  }
  0x28   : > { %s524_s19 = sshll.u32 (!%p887_p12), %s935_s2, 3  ;;  %s229_s17 = scalar_lea.sflag (!%p887_p12), [#allocation4], %s935_s2 }
  0x29   : > { %s232_s4 = scalar_lea.vmem (!%p887_p12), [#allocation3], %s524_s19 }
  0x2c   : > { %759 = dma.done.wait (%p870_p7), %s229_s17, 128  }
  0x2d   : > { %761 = vsyncadd (%p870_p7), %s229_s17, 4294967168  ;;  %s525_s30 = sshll.u32 %s935_s2, 1  ;;  %s239_s29 = scalar_lea.sflag [#allocation8], %s935_s2 }
  0x2e   : > { %s945_s5 = scalar_lea.vmem [#allocation7], %s525_s30 }
  0x2f   : > { %763 = dma.done.wait (%p870_p7), %s239_s29, 32  }
  0x30   : > { %765 = vsyncadd (%p870_p7), %s239_s29, 4294967264 }
  0x31   : > { %767 = dma.done.wait (%p860_p3), [#allocation6], 16  }
  0x32   : > { %769 = vsyncadd (%p860_p3), [#allocation6], 4294967280 }
  0x33   : > { %253 = sfence }
  0x34   : > { %v284_v0 = vld [vmem:[%s232_s4] sm:$0x3]  ;;  %v801_v1 = vmov 0.0   ;;  %v527_v2 = vld [vmem:[%s232_s4 + $0x2] sm:$0x3]  ;;  %s956_s21 = sld [smem:[#allocation9]]  ;;  %s391_s8 = scalar_lea.hbm %s1016_s3, %s788_s15 }
  0x35   : > { %282 = vst [vmem:[#allocation2] sm:$0x3] %v801_v1  ;;  %v528_v3 = vld [vmem:[%s232_s4 + $0x4] sm:$0x3]  ;;  %v287_v4 = vmax.f32 %v284_v0, %v527_v2  ;;  %v529_v5 = vld [vmem:[%s232_s4 + $0x6] sm:$0x3] }
  0x36   : > { %v283_v23 = vld [vmem:[%s945_s5] sm:$0x3]  ;;  %s960_s23 = sld [smem:[#allocation9 + $0x1]]  ;;  %vm368_vm8 = vcmask 1041408   ;;  %s275_s10 = scalar_lea.vmem [#allocation10], %s935_s2 }
  0x37   : > { %v290_v6 = vmax.f32 %v287_v4, %v528_v3  ;;  %vm298_vm0 = vcmp.eq.s32.totalorder %v283_v23, 0  ;;  %vm308_vm1 = vcmp.eq.s32.totalorder %v283_v23, 1  ;;  %vm318_vm2 = vcmp.eq.s32.totalorder %v283_v23, 2  ;;  %s531_s22 = sld [smem:[#allocation9 + $0x2]]  ;;  %s393_s7 = sshll.u32 %s275_s10, 4  ;;  %s394_s7 = int_to_ptr.vmem [resolvable:$true] %s393_s7 }
  0x38   : > { %vm328_vm5 = vcmp.eq.s32.totalorder %v283_v23, 3  ;;  %s532_s27 = sld [smem:[#allocation9 + $0x3]]  ;;  %s395_s9 = sshll.u32 %s391_s8, 4  ;;  %s396_s9 = int_to_ptr.hbm [resolvable:$true] %s395_s9 }
  0x39   : > { %v293_v7 = vmax.f32 %v290_v6, %v529_v5  ;;  %s382_s20 = scalar_lea.sflag [#allocation5], %s935_s2  ;;  %s720_s18 = sshra.s32 %s396_s9, 4  ;;  %s721_s18 = int_to_ptr.hbm [resolvable:$true] %s720_s18 }
  0x3a   : > { %v302_v37 = vstv %s956_s21  ;;  %s722_s19 = scalar_lea.hbm %s721_s18, 1  ;;  %s726_s15 = scalar_lea.hbm %s1016_s3, 2 }
  0x3b   : > { %v294_v8 = vsub.f32 %v284_v0, %v293_v7  ;;  %v304_v9 = vsub.f32 %v527_v2, %v293_v7  ;;  %v314_v10 = vsub.f32 %v528_v3, %v293_v7  ;;  %v324_v11 = vsub.f32 %v529_v5, %v293_v7  ;;  %p723_p3 = scmp.ne.s32.totalorder %s721_s18, %s722_s19  ;;  %p727_p11 = scmp.lt.s32.totalorder %s721_s18, %s1016_s3 }
  0x3c   : > { %v303_v43 = vsel %vm298_vm0, %v302_v37, 0.0  ;;  %v312_v44 = vstv %s960_s23  ;;  %v358_v62 = vld [vmem:[#allocation2] sm:$0x3]  ;;  %p728_p12 = scmp.lt.s32.totalorder %s726_s15, %s722_s19 }
  0x3d   : > { %v295_v12 = vmul.f32 1.442695, %v294_v8  ;;  %v305_v13 = vmul.f32 1.442695, %v304_v9  ;;  %v315_v14 = vmul.f32 1.442695, %v314_v10  ;;  %v313_v49 = vsel %vm308_vm1, %v312_v44, %v303_v43  ;;  %p724_p7 = pnand %p723_p3, %p874_p8 }
  0x3e   : > { %v325_v15 = vmul.f32 1.442695, %v324_v11  ;;  %v299_v24 = vsel %vm298_vm0, %v294_v8, 0.0  ;;  %v322_v50 = vstv %s531_s22  ;;  %v332_v53 = vstv %s532_s27  ;;  %p729_p0 = por %p728_p12, %p727_p11 }
  0x3f   : > { %619 = vpow2.f32 %v295_v12  ;;  %v309_v28 = vsel %vm308_vm1, %v304_v9, %v299_v24  ;;  %v323_v52 = vsel %vm318_vm2, %v322_v50, %v313_v49  ;;  %p725_p10 = pneg %p724_p7 }
  0x40   : > { %621 = vpow2.f32 %v305_v13  ;;  %v319_v34 = vsel %vm318_vm2, %v314_v10, %v309_v28  ;;  %v333_v57 = vsel %vm328_vm5, %v332_v53, %v323_v52 }
  0x41   : > { %623 = vpow2.f32 %v315_v14  ;;  %v329_v41 = vsel %vm328_vm5, %v324_v11, %v319_v34  ;;  %p730_p1 = pnand %p729_p0, %p725_p10 }
  0x42   : > { %625 = vpow2.f32 %v325_v15 }
  0x45   : > { %v620_v16 = vpop.eup %619 }
  0x46   : > { %v622_v17 = vpop.eup %621  ;;  %v300_v25 = vsel %vm298_vm0, %v620_v16, 0.0 }
  0x47   : > { %v624_v18 = vpop.eup %623  ;;  %v307_v19 = vadd.f32 %v622_v17, %v620_v16  ;;  %v310_v29 = vsel %vm308_vm1, %v622_v17, %v300_v25 }
  0x48   : > { %v626_v20 = vpop.eup %625  ;;  %v320_v35 = vsel %vm318_vm2, %v624_v18, %v310_v29 }
  0x49   : > { %v317_v21 = vadd.f32 %v624_v18, %v307_v19  ;;  %v330_v42 = vsel %vm328_vm5, %v626_v20, %v320_v35 }
  0x4b   : > { %v327_v22 = vadd.f32 %v626_v20, %v317_v21 }
  0x4d   : > { %627 = vrcp.f32 %v327_v22  ;;  %v345_v30 = vand.u32 2147483648, %v327_v22  ;;  %vm339_vm3 = vweird.f32 %v327_v22  ;;  %v343_v32 = vand.u32 2147483647, %v327_v22 }
  0x4e   : > { %629 = vlog2.f32 %v327_v22 }
  0x4f   : > { %v346_v38 = vor.u32 1.1754944e-38, %v345_v30  ;;  %vm344_vm7 = vcmp.eq.f32.partialorder %v343_v32, 8.507059e+37 }
  0x53   : > { %v628_v26 = vpop.eup %627 }
  0x54   : > { %v335_v27 = vmul.f32 %v628_v26, %v327_v22  ;;  %vm340_vm4 = vweird.f32 %v628_v26  ;;  %v630_v33 = vpop.eup %629 }
  0x55   : > { %vm341_vm6 = vmor %vm339_vm3, %vm340_vm4  ;;  %v350_v40 = vmul.f32 0.6931472, %v630_v33 }
  0x56   : > { %v336_v31 = vsub.f32 1.0, %v335_v27 }
  0x57   : > { %v351_v48 = vsub.f32 %v329_v41, %v350_v40 }
  0x58   : > { %v337_v36 = vmul.f32 %v628_v26, %v336_v31 }
  0x59   : > { %v354_v55 = vmax.f32 %v351_v48, -18.420681 }
  0x5a   : > { %v338_v39 = vadd.f32 %v628_v26, %v337_v36 }
  0x5b   : > { %v355_v58 = vmin.f32 %v354_v55, 0.0 }
  0x5c   : > { %v342_v45 = vsel %vm341_vm6, %v628_v26, %v338_v39 }
  0x5d   : > { %v347_v46 = vsel %vm344_vm7, %v346_v38, %v342_v45 }
  0x5e   : > { %v348_v47 = vmul.f32 %v347_v46, %v330_v42 }
  0x60   : > { %v352_v51 = vmax.f32 %v348_v47, 1e-08 }
  0x62   : > { %v353_v54 = vmin.f32 %v352_v51, 1.0 }
  0x64   : > { %v356_v56 = vsub.f32 1.0, %v353_v54 }
  0x66   : > { %v357_v59 = vmul.f32 %v356_v56, %v356_v56 }
  0x68   : > { %v359_v60 = vmul.f32 %v357_v59, %v333_v57 }
  0x6a   : > { %v360_v61 = vmul.f32 %v359_v60, %v355_v58 }
  0x6c   : > { %v361_v63 = vsub.f32 0.0, %v360_v61 }
  0x6e   : > { %v362_v0 = vadd.f32 %v361_v63, %v358_v62 }
  0x70   : > { %363 = vst [vmem:[#allocation2] sm:$0x3] %v362_v0 }
  0x77   : > { %v367_v1 = vld [vmem:[#allocation2] sm:$0x3] }
  0x78   : > { %v369_v2 = vsel %vm368_vm8, %v367_v1, 0.0 }
  0x79   : > { %370 = vadd.xlane.f32.xlu0 %v369_v2 }
  0xec   : > { %v371_v3 = vpop.xlane.xlu0 %370 }
  0xed   : > { %v372_v4 = vrot.slane %v371_v3, 4 }
  0xef   : > { %v373_v5 = vadd.f32 %v372_v4, %v371_v3 }
  0xf1   : > { %v374_v6 = vrot.slane %v373_v5, 2 }
  0xf3   : > { %v375_v7 = vadd.f32 %v374_v6, %v373_v5 }
  0xf5   : > { %v376_v8 = vrot.slane %v375_v7, 1 }
  0xf7   : > { %v377_v9 = vadd.f32 %v376_v8, %v375_v7 }
  0xf9   : > { %536 = vpush %v377_v9 }
 0x12a   : > { %s537_s11 = spop %536 }
 0x12b   : > { %v379_v10 = vstv %s537_s11 }
 0x12c   : > { %380 = vst [vmem:[%s275_s10] sm:$0x1] %v379_v10 }
 0x12d   : > { %733 = shalt.err (!%p730_p1)
}
 0x12e   : > { %546 = dma.vmem_to_hbm [thread:$0]  (%p874_p8), %s394_s7, 16, %s396_s9, %s382_s20  }
 0x12f PF: > { %s1031_s2 = sld [smem:[#allocation15_spill]]  ;;  %s407_s5 = sand.u32 1, %s776_s12  }
 0x130   : > { %p560_p2 = pnand %p517_p13, %p878_p9  ;;  %s408_s21 = scalar_lea.sflag [#allocation5], %s407_s5 }
 0x132   : > { %p561_p4 = pneg %p560_p2 }
 0x134   : > { %771 = dma.done.wait (%p561_p4), %s408_s21, 16  }
 0x135   : > { %773 = vsyncadd (%p561_p4), %s408_s21, 4294967280  ;;  %s23_s17 = sadd.s32 1, %s1031_s2   ;;  %s1032_s24 = sld [smem:[#allocation16_spill]] }
 0x136   : > { %p20_p6 = scmp.ge.s32.totalorder %s23_s17, 4   ;;  %s1033_s12 = smov %s780_s13 }
 0x137   : > { %s1034_s13 = smov %s784_s14  ;;  %s1035_s14 = smov %s919_s26 }
 0x138   : > { %s1036_s15 = smov %s792_s16  ;;  %22 = sbr.rel (!%p20_p6) target bundleno = 11 (0xb), region = 106 }
 0x13b   : > { %s1037_s16 = smov %s1032_s24 }
 0x13d   :  { %413 = vsyncpa [#allocation4], 1 }
 0x13e   :  { %415 = vsyncpa [#allocation4 + $0x1], 1 }
 0x13f   :  { %416 = vsyncpa [#allocation8], 1 }
 0x140   :  { %418 = vsyncpa [#allocation8 + $0x1], 1 }
 0x141   :  { %419 = vsyncpa [#allocation5], 1 }
 0x142   :  { %421 = vsyncpa [#allocation5 + $0x1], 1 }
 0x143   :  { %422 = vsyncpa [#allocation6], 1 }
 0x144   :  { %424 = vsyncpa [#allocation6 + $0x1], 1 }

</bundles_post_ra>
